<compile_context>
chip_gen: v5e
topology: v5e:2x2
jax: 0.10.0
libtpu: 0.0.40
codegen_flags: <defaults>
</compile_context>

<pallas_src>
import functools

import jax
import jax.numpy as jnp
from jax.experimental import pallas as pl
from jax.experimental.pallas import tpu as pltpu

LANE = 128        # vreg lane width
SUBLANE = 8       # vreg sublane height (f32)
_MIB = 1024 * 1024


def _round_up(v, m):
    return ((v + m - 1) // m) * m


def _vmem_capacity_bytes():
    """Physical per-core VMEM; conservative fallback if the query fails."""
    try:
        cap = int(pltpu.get_tpu_info().vmem_capacity_bytes)
        if cap > 0:
            return cap
    except Exception:
        pass
    return 64 * _MIB            # v7x is the smallest current part


def _feature_alignment(dim):
    """Lane alignment for a feature dim.

    v6e/v7x MXUs are 2x256x256, so large dims get 256-lane alignment there;
    v5e (4x128x128) and small dims stay at 128 to avoid wasted FLOPs.
    """
    if dim < 256:
        return LANE
    try:
        kind = jax.devices()[0].device_kind.lower()
        if "v4" in kind or "v5" in kind:
            return LANE
    except Exception:
        pass
    return 256


def _mlp_kernel(x_ref, *refs, n_layers: int):
    """Fused MLP body: chained (bf16 matmul -> f32 bias/ReLU) in VMEM/vregs.

    refs = (w0, b0, w1, b1, ..., w_{L-1}, b_{L-1}, o_ref)
    """
    o_ref = refs[-1]
    wb = refs[:-1]
    h = x_ref[...].astype(jnp.bfloat16)                 # bf16 feed to the MXU
    for li in range(n_layers):
        w = wb[2 * li][...]                             # (K, N_pad) bf16
        b = wb[2 * li + 1][...].astype(jnp.float32)     # (1, N_pad)
        acc = jnp.dot(h, w, preferred_element_type=jnp.float32)  # f32 accum
        acc = acc + b                                   # bias epilogue in f32
        if li != n_layers - 1:
            h = jnp.maximum(acc, 0.0).astype(jnp.bfloat16)  # ReLU, back to bf16
        else:
            h = acc
    o_ref[...] = h.astype(o_ref.dtype)                  # single lane-dense store


def init_mlp_params(key, layers):
    """Matches MLP.initialize(): weight.normal_(), bias.normal_() (std normal).

    Weights are stored as (in, out) = transpose of torch's (out, in); the
    i.i.d. standard-normal init makes the distributions identical.  The
    kernel-side copies are cast to bf16 and zero-padded to lane-dense feature
    widths ONCE here, so the forward path has no per-call layout/cast work.
    The layer-0 weight keeps its unpadded input dim so the activation never
    needs K padding.
    """
    padded = [_round_up(d, _feature_alignment(d)) for d in layers]
    params = []          # f32, unpadded   (reference math)
    kernel_params = []   # bf16, lane-dense (kernel-ready)
    for li, (in_dim, out_dim) in enumerate(zip(layers[:-1], layers[1:])):
        key, kw, kb = jax.random.split(key, 3)
        w = jax.random.normal(kw, (in_dim, out_dim), dtype=jnp.float32)
        b = jax.random.normal(kb, (out_dim,), dtype=jnp.float32)
        rows = in_dim if li == 0 else padded[li]
        wp = (jnp.zeros((rows, padded[li + 1]), jnp.bfloat16)
              .at[:in_dim, :out_dim].set(w.astype(jnp.bfloat16)))
        bp = (jnp.zeros((1, padded[li + 1]), jnp.bfloat16)
              .at[0, :out_dim].set(b.astype(jnp.bfloat16)))
        params.append((w, b))
        kernel_params.append((wp, bp))
    return params, kernel_params, padded


def mlp_forward(x, kernel_params, padded_dims, out_dim, *, conservative=False):
    """Run the whole MLP as one fused Pallas kernel; returns (M, out_dim).

    conservative=True drops the tuned compiler knobs (single-buffered weights,
    explicit VMEM limit, cost estimate); it is used as an automatic fallback.
    """
    M, K = x.shape
    n_layers = len(kernel_params)
    assert K == kernel_params[0][0].shape[0], "x feature dim mismatch"
    N_pad = padded_dims[-1]

    # ---- VMEM budget ------------------------------------------------------
    cap = _vmem_capacity_bytes()
    vmem_limit = min((cap * 4) // 5, 100 * _MIB)   # ~100 MiB v5e/v6e, ~51 MiB v7x
    weight_bufs = 1 if not conservative else 2
    param_bytes = weight_bufs * sum(
        wp.size * wp.dtype.itemsize + bp.size * bp.dtype.itemsize
        for wp, bp in kernel_params)
    widest = max(padded_dims[1:])

    def _tile_bytes(tm):
        x_tile = 2 * tm * K * x.dtype.itemsize        # double-buffered input
        o_tile = 2 * tm * N_pad * x.dtype.itemsize    # double-buffered output
        work = tm * widest * 6                        # f32 acc + bf16 h copy
        return x_tile + o_tile + work

    # ---- batch tiling -------------------------------------------------------
    tm_cap = 256 if cap <= 64 * _MIB else 512         # smaller tiles on v7x
    if M <= SUBLANE:
        tm = M                                        # full-extent block
    else:
        m8 = _round_up(M, SUBLANE)
        tm = min(tm_cap, m8)
        if tm == m8:
            # Split into >=2 tiles so the "parallel" M axis can shard across
            # v7x's two TensorCores (and pipeline DMA on v5e/v6e).
            tm = _round_up(pl.cdiv(m8, 2), SUBLANE)
        while tm > SUBLANE and param_bytes + _tile_bytes(tm) > vmem_limit:
            tm = _round_up(tm // 2, SUBLANE)
    if param_bytes + _tile_bytes(tm) > vmem_limit:
        # TODO(synk): stream weights from HBM (memory_space=pl.ANY +
        # pltpu.emit_pipeline over K chunks) when the resident-weight design
        # does not fit in VMEM (e.g. 4096x4096 layers on v7x).
        raise ValueError("MLP weights do not fit the VMEM budget; "
                         "streaming fallback not implemented.")

    M_pad = _round_up(M, tm)
    grid_m = M_pad // tm
    # Steady-state callers should supply tile-aligned batches so this pad is a
    # no-op (it is for the demo); only the batch axis is ever padded.
    x_in = x if M_pad == M else jnp.zeros((M_pad, K), x.dtype).at[:M, :].set(x)

    # ---- specs --------------------------------------------------------------
    def _resident_spec(shape):
        # Constant index_map: block is fetched once and stays resident in VMEM.
        # (The closure captures nothing, so there is no late-binding hazard.)
        if conservative:
            return pl.BlockSpec(shape, lambda i: (0, 0))
        # Single-buffer resident params: double-buffering them only doubles
        # the VMEM held by weights without any overlap benefit.
        return pl.BlockSpec(shape, lambda i: (0, 0),
                            pipeline_mode=pl.Buffered(buffer_count=1))

    in_specs = [pl.BlockSpec((tm, K), lambda i: (i, 0))]
    flat_params = []
    for wp, bp in kernel_params:
        flat_params += [wp, bp]
        in_specs.append(_resident_spec(wp.shape))
        in_specs.append(_resident_spec(bp.shape))

    cp_kwargs = dict(dimension_semantics=("parallel",))   # megacore-shardable M
    call_kwargs = {}
    if not conservative:
        cp_kwargs["vmem_limit_bytes"] = int(vmem_limit)
        flops = 2 * M_pad * sum(int(wp.shape[0]) * int(wp.shape[1])
                                for wp, _ in kernel_params)
        bytes_accessed = (x_in.size * x_in.dtype.itemsize
                          + M_pad * N_pad * x.dtype.itemsize
                          + param_bytes // weight_bufs)
        call_kwargs["cost_estimate"] = pl.CostEstimate(
            flops=int(flops), transcendentals=0,
            bytes_accessed=int(bytes_accessed))

    out_pad = pl.pallas_call(
        functools.partial(_mlp_kernel, n_layers=n_layers),
        out_shape=jax.ShapeDtypeStruct((M_pad, N_pad), x.dtype),
        grid=(grid_m,),
        in_specs=in_specs,
        out_specs=pl.BlockSpec((tm, N_pad), lambda i: (i, 0)),
        compiler_params=pltpu.CompilerParams(**cp_kwargs),
        **call_kwargs,
    )(x_in, *flat_params)
    return out_pad[:M, :out_dim]


if __name__ == "__main__":
    key = jax.random.PRNGKey(0)

    # layers = [in, hidden, hidden, out]
    layers = [16, 32, 32, 8]
    batch = 8

    key, kx = jax.random.split(key)
    x = jax.random.normal(kx, (batch, layers[0]), dtype=jnp.float32)

    params, kernel_params, padded_dims = init_mlp_params(key, layers)

    try:
        out = mlp_forward(x, kernel_params, padded_dims, layers[-1])
    except Exception:
        # Tuned compiler knobs rejected on this JAX/TPU combination; retry with
        # the plain (still fully fused) configuration.
        out = mlp_forward(x, kernel_params, padded_dims, layers[-1],
                          conservative=True)
    out = jax.block_until_ready(out)

    # Pure-JAX reference mirroring the kernel's bf16-weight / f32-accumulate
    # data path (padded weight/bias columns are exact zeros and cannot leak).
    ref = x
    for li, (w, b) in enumerate(params):
        ref = jnp.dot(ref.astype(jnp.bfloat16), w.astype(jnp.bfloat16),
                      preferred_element_type=jnp.float32)
        ref = ref + b.astype(jnp.bfloat16).astype(jnp.float32)
        if li != len(params) - 1:
            ref = jnp.maximum(ref, 0.0)

    assert out.shape == (batch, layers[-1])
    assert jnp.allclose(out, ref, atol=1e-2, rtol=1e-2), (
        float(jnp.max(jnp.abs(out - ref))))

    print("KERNEL_OK")
</pallas_src>

<mosaic_0001>
module attributes {stable_mosaic.version = 11 : i64} {
  func.func @_mlp_kernel(%arg0: i32, %arg1: memref<8x16xf32, #tpu.memory_space<vmem>>, %arg2: memref<16x128xbf16, #tpu.memory_space<vmem>>, %arg3: memref<1x128xbf16, #tpu.memory_space<vmem>>, %arg4: memref<128x128xbf16, #tpu.memory_space<vmem>>, %arg5: memref<1x128xbf16, #tpu.memory_space<vmem>>, %arg6: memref<128x128xbf16, #tpu.memory_space<vmem>>, %arg7: memref<1x128xbf16, #tpu.memory_space<vmem>>, %arg8: memref<8x128xf32, #tpu.memory_space<vmem>>) attributes {dimension_semantics = [#tpu.dimension_semantics<parallel>], iteration_bounds = array<i64: 1>, scalar_prefetch = 0 : i64, scratch_operands = 0 : i64, tpu.core_type = #tpu.core_type<tc>, window_params = [{transform_indices = @transform_0, window_bounds = array<i64: 8, 16>}, {pipeline_mode = #tpu.pipeline_mode<synchronous>, transform_indices = @transform_1, window_bounds = array<i64: 16, 128>}, {pipeline_mode = #tpu.pipeline_mode<synchronous>, transform_indices = @transform_2, window_bounds = array<i64: 1, 128>}, {pipeline_mode = #tpu.pipeline_mode<synchronous>, transform_indices = @transform_3, window_bounds = array<i64: 128, 128>}, {pipeline_mode = #tpu.pipeline_mode<synchronous>, transform_indices = @transform_4, window_bounds = array<i64: 1, 128>}, {pipeline_mode = #tpu.pipeline_mode<synchronous>, transform_indices = @transform_5, window_bounds = array<i64: 128, 128>}, {pipeline_mode = #tpu.pipeline_mode<synchronous>, transform_indices = @transform_6, window_bounds = array<i64: 1, 128>}, {transform_indices = @transform_7, window_bounds = array<i64: 8, 128>}]} {
    %c0 = arith.constant 0 : index
    %c0_0 = arith.constant 0 : index
    %0 = vector.load %arg1[%c0, %c0_0] : memref<8x16xf32, #tpu.memory_space<vmem>>, vector<8x16xf32>
    %1 = arith.truncf %0 : vector<8x16xf32> to vector<8x16xbf16>
    %c0_1 = arith.constant 0 : index
    %c0_2 = arith.constant 0 : index
    %2 = vector.load %arg2[%c0_1, %c0_2] : memref<16x128xbf16, #tpu.memory_space<vmem>>, vector<16x128xbf16>
    %c0_3 = arith.constant 0 : index
    %c0_4 = arith.constant 0 : index
    %3 = vector.load %arg3[%c0_3, %c0_4] : memref<1x128xbf16, #tpu.memory_space<vmem>>, vector<1x128xbf16>
    %4 = arith.extf %3 : vector<1x128xbf16> to vector<1x128xf32>
    %cst = arith.constant dense<0.000000e+00> : vector<8x128xf32>
    %5 = tpu.matmul %1, %2, %cst {dimension_numbers = #tpu.dot_dimension_numbers<[1], [0], [0], [1], [0, 0, 1, 1], [], []>} : vector<8x16xbf16>, vector<16x128xbf16>, vector<8x128xf32> -> vector<8x128xf32>
    %6 = vector.broadcast %4 : vector<1x128xf32> to vector<8x128xf32>
    %7 = arith.addf %5, %6 : vector<8x128xf32>
    %cst_5 = arith.constant 0.000000e+00 : f32
    %8 = vector.broadcast %cst_5 : f32 to vector<8x128xf32>
    %9 = arith.maximumf %7, %8 : vector<8x128xf32>
    %10 = arith.truncf %9 : vector<8x128xf32> to vector<8x128xbf16>
    %c0_6 = arith.constant 0 : index
    %c0_7 = arith.constant 0 : index
    %11 = vector.load %arg4[%c0_6, %c0_7] : memref<128x128xbf16, #tpu.memory_space<vmem>>, vector<128x128xbf16>
    %c0_8 = arith.constant 0 : index
    %c0_9 = arith.constant 0 : index
    %12 = vector.load %arg5[%c0_8, %c0_9] : memref<1x128xbf16, #tpu.memory_space<vmem>>, vector<1x128xbf16>
    %13 = arith.extf %12 : vector<1x128xbf16> to vector<1x128xf32>
    %cst_10 = arith.constant dense<0.000000e+00> : vector<8x128xf32>
    %14 = tpu.matmul %10, %11, %cst_10 {dimension_numbers = #tpu.dot_dimension_numbers<[1], [0], [0], [1], [0, 0, 1, 1], [], []>} : vector<8x128xbf16>, vector<128x128xbf16>, vector<8x128xf32> -> vector<8x128xf32>
    %15 = vector.broadcast %13 : vector<1x128xf32> to vector<8x128xf32>
    %16 = arith.addf %14, %15 : vector<8x128xf32>
    %cst_11 = arith.constant 0.000000e+00 : f32
    %17 = vector.broadcast %cst_11 : f32 to vector<8x128xf32>
    %18 = arith.maximumf %16, %17 : vector<8x128xf32>
    %19 = arith.truncf %18 : vector<8x128xf32> to vector<8x128xbf16>
    %c0_12 = arith.constant 0 : index
    %c0_13 = arith.constant 0 : index
    %20 = vector.load %arg6[%c0_12, %c0_13] : memref<128x128xbf16, #tpu.memory_space<vmem>>, vector<128x128xbf16>
    %c0_14 = arith.constant 0 : index
    %c0_15 = arith.constant 0 : index
    %21 = vector.load %arg7[%c0_14, %c0_15] : memref<1x128xbf16, #tpu.memory_space<vmem>>, vector<1x128xbf16>
    %22 = arith.extf %21 : vector<1x128xbf16> to vector<1x128xf32>
    %cst_16 = arith.constant dense<0.000000e+00> : vector<8x128xf32>
    %23 = tpu.matmul %19, %20, %cst_16 {dimension_numbers = #tpu.dot_dimension_numbers<[1], [0], [0], [1], [0, 0, 1, 1], [], []>} : vector<8x128xbf16>, vector<128x128xbf16>, vector<8x128xf32> -> vector<8x128xf32>
    %24 = vector.broadcast %22 : vector<1x128xf32> to vector<8x128xf32>
    %25 = arith.addf %23, %24 : vector<8x128xf32>
    %c0_17 = arith.constant 0 : index
    %c0_18 = arith.constant 0 : index
    %26 = vector.load %arg8[%c0_17, %c0_18] : memref<8x128xf32, #tpu.memory_space<vmem>>, vector<8x128xf32>
    tpu.vector_store %arg8[%c0_17, %c0_18], %25 {strides = array<i32>} : memref<8x128xf32, #tpu.memory_space<vmem>>, vector<8x128xf32>,
    return
  }
  func.func @transform_0(%arg0: i32) -> (i32, i32) {
    %c0_i32 = arith.constant 0 : i32
    %c0_i32_0 = arith.constant 0 : i32
    return %arg0, %c0_i32 : i32, i32
  }
  func.func @transform_1(%arg0: i32) -> (i32, i32) {
    %c0_i32 = arith.constant 0 : i32
    %c0_i32_0 = arith.constant 0 : i32
    %c0_i32_1 = arith.constant 0 : i32
    return %c0_i32, %c0_i32_0 : i32, i32
  }
  func.func @transform_2(%arg0: i32) -> (i32, i32) {
    %c0_i32 = arith.constant 0 : i32
    %c0_i32_0 = arith.constant 0 : i32
    %c0_i32_1 = arith.constant 0 : i32
    return %c0_i32, %c0_i32_0 : i32, i32
  }
  func.func @transform_3(%arg0: i32) -> (i32, i32) {
    %c0_i32 = arith.constant 0 : i32
    %c0_i32_0 = arith.constant 0 : i32
    %c0_i32_1 = arith.constant 0 : i32
    return %c0_i32, %c0_i32_0 : i32, i32
  }
  func.func @transform_4(%arg0: i32) -> (i32, i32) {
    %c0_i32 = arith.constant 0 : i32
    %c0_i32_0 = arith.constant 0 : i32
    %c0_i32_1 = arith.constant 0 : i32
    return %c0_i32, %c0_i32_0 : i32, i32
  }
  func.func @transform_5(%arg0: i32) -> (i32, i32) {
    %c0_i32 = arith.constant 0 : i32
    %c0_i32_0 = arith.constant 0 : i32
    %c0_i32_1 = arith.constant 0 : i32
    return %c0_i32, %c0_i32_0 : i32, i32
  }
  func.func @transform_6(%arg0: i32) -> (i32, i32) {
    %c0_i32 = arith.constant 0 : i32
    %c0_i32_0 = arith.constant 0 : i32
    %c0_i32_1 = arith.constant 0 : i32
    return %c0_i32, %c0_i32_0 : i32, i32
  }
  func.func @transform_7(%arg0: i32) -> (i32, i32) {
    %c0_i32 = arith.constant 0 : i32
    %c0_i32_0 = arith.constant 0 : i32
    return %arg0, %c0_i32 : i32, i32
  }
}

module attributes {stable_mosaic.version = 11 : i64} {
  func.func @_mlp_kernel(%arg0: i32, %arg1: memref<8x16xf32, #tpu.memory_space<vmem>>, %arg2: memref<16x128xbf16, #tpu.memory_space<vmem>>, %arg3: memref<1x128xbf16, #tpu.memory_space<vmem>>, %arg4: memref<128x128xbf16, #tpu.memory_space<vmem>>, %arg5: memref<1x128xbf16, #tpu.memory_space<vmem>>, %arg6: memref<128x128xbf16, #tpu.memory_space<vmem>>, %arg7: memref<1x128xbf16, #tpu.memory_space<vmem>>, %arg8: memref<8x128xf32, #tpu.memory_space<vmem>>) attributes {dimension_semantics = [#tpu.dimension_semantics<parallel>], iteration_bounds = array<i64: 1>, scalar_prefetch = 0 : i64, scratch_operands = 0 : i64, tpu.core_type = #tpu.core_type<tc>, window_params = [{transform_indices = @transform_0, window_bounds = array<i64: 8, 16>}, {pipeline_mode = #tpu.pipeline_mode<synchronous>, transform_indices = @transform_1, window_bounds = array<i64: 16, 128>}, {pipeline_mode = #tpu.pipeline_mode<synchronous>, transform_indices = @transform_2, window_bounds = array<i64: 1, 128>}, {pipeline_mode = #tpu.pipeline_mode<synchronous>, transform_indices = @transform_3, window_bounds = array<i64: 128, 128>}, {pipeline_mode = #tpu.pipeline_mode<synchronous>, transform_indices = @transform_4, window_bounds = array<i64: 1, 128>}, {pipeline_mode = #tpu.pipeline_mode<synchronous>, transform_indices = @transform_5, window_bounds = array<i64: 128, 128>}, {pipeline_mode = #tpu.pipeline_mode<synchronous>, transform_indices = @transform_6, window_bounds = array<i64: 1, 128>}, {transform_indices = @transform_7, window_bounds = array<i64: 8, 128>}]} {
    %c0 = arith.constant 0 : index
    %c0_0 = arith.constant 0 : index
    %0 = vector.load %arg1[%c0, %c0_0] : memref<8x16xf32, #tpu.memory_space<vmem>>, vector<8x16xf32>
    %1 = arith.truncf %0 : vector<8x16xf32> to vector<8x16xbf16>
    %c0_1 = arith.constant 0 : index
    %c0_2 = arith.constant 0 : index
    %2 = vector.load %arg2[%c0_1, %c0_2] : memref<16x128xbf16, #tpu.memory_space<vmem>>, vector<16x128xbf16>
    %c0_3 = arith.constant 0 : index
    %c0_4 = arith.constant 0 : index
    %3 = vector.load %arg3[%c0_3, %c0_4] : memref<1x128xbf16, #tpu.memory_space<vmem>>, vector<1x128xbf16>
    %4 = arith.extf %3 : vector<1x128xbf16> to vector<1x128xf32>
    %cst = arith.constant dense<0.000000e+00> : vector<8x128xf32>
    %5 = tpu.matmul %1, %2, %cst {dimension_numbers = #tpu.dot_dimension_numbers<[1], [0], [0], [1], [0, 0, 1, 1], [], []>} : vector<8x16xbf16>, vector<16x128xbf16>, vector<8x128xf32> -> vector<8x128xf32>
    %6 = vector.broadcast %4 : vector<1x128xf32> to vector<8x128xf32>
    %7 = arith.addf %5, %6 : vector<8x128xf32>
    %cst_5 = arith.constant 0.000000e+00 : f32
    %8 = vector.broadcast %cst_5 : f32 to vector<8x128xf32>
    %9 = arith.maximumf %7, %8 : vector<8x128xf32>
    %10 = arith.truncf %9 : vector<8x128xf32> to vector<8x128xbf16>
    %c0_6 = arith.constant 0 : index
    %c0_7 = arith.constant 0 : index
    %11 = vector.load %arg4[%c0_6, %c0_7] : memref<128x128xbf16, #tpu.memory_space<vmem>>, vector<128x128xbf16>
    %c0_8 = arith.constant 0 : index
    %c0_9 = arith.constant 0 : index
    %12 = vector.load %arg5[%c0_8, %c0_9] : memref<1x128xbf16, #tpu.memory_space<vmem>>, vector<1x128xbf16>
    %13 = arith.extf %12 : vector<1x128xbf16> to vector<1x128xf32>
    %cst_10 = arith.constant dense<0.000000e+00> : vector<8x128xf32>
    %14 = tpu.matmul %10, %11, %cst_10 {dimension_numbers = #tpu.dot_dimension_numbers<[1], [0], [0], [1], [0, 0, 1, 1], [], []>} : vector<8x128xbf16>, vector<128x128xbf16>, vector<8x128xf32> -> vector<8x128xf32>
    %15 = vector.broadcast %13 : vector<1x128xf32> to vector<8x128xf32>
    %16 = arith.addf %14, %15 : vector<8x128xf32>
    %cst_11 = arith.constant 0.000000e+00 : f32
    %17 = vector.broadcast %cst_11 : f32 to vector<8x128xf32>
    %18 = arith.maximumf %16, %17 : vector<8x128xf32>
    %19 = arith.truncf %18 : vector<8x128xf32> to vector<8x128xbf16>
    %c0_12 = arith.constant 0 : index
    %c0_13 = arith.constant 0 : index
    %20 = vector.load %arg6[%c0_12, %c0_13] : memref<128x128xbf16, #tpu.memory_space<vmem>>, vector<128x128xbf16>
    %c0_14 = arith.constant 0 : index
    %c0_15 = arith.constant 0 : index
    %21 = vector.load %arg7[%c0_14, %c0_15] : memref<1x128xbf16, #tpu.memory_space<vmem>>, vector<1x128xbf16>
    %22 = arith.extf %21 : vector<1x128xbf16> to vector<1x128xf32>
    %cst_16 = arith.constant dense<0.000000e+00> : vector<8x128xf32>
    %23 = tpu.matmul %19, %20, %cst_16 {dimension_numbers = #tpu.dot_dimension_numbers<[1], [0], [0], [1], [0, 0, 1, 1], [], []>} : vector<8x128xbf16>, vector<128x128xbf16>, vector<8x128xf32> -> vector<8x128xf32>
    %24 = vector.broadcast %22 : vector<1x128xf32> to vector<8x128xf32>
    %25 = arith.addf %23, %24 : vector<8x128xf32>
    %c0_17 = arith.constant 0 : index
    %c0_18 = arith.constant 0 : index
    %26 = vector.load %arg8[%c0_17, %c0_18] : memref<8x128xf32, #tpu.memory_space<vmem>>, vector<8x128xf32>
    tpu.vector_store %arg8[%c0_17, %c0_18], %25 {strides = array<i32>} : memref<8x128xf32, #tpu.memory_space<vmem>>, vector<8x128xf32>,
    return
  }
  func.func @transform_0(%arg0: i32) -> (i32, i32) {
    %c0_i32 = arith.constant 0 : i32
    %c0_i32_0 = arith.constant 0 : i32
    return %arg0, %c0_i32 : i32, i32
  }
  func.func @transform_1(%arg0: i32) -> (i32, i32) {
    %c0_i32 = arith.constant 0 : i32
    %c0_i32_0 = arith.constant 0 : i32
    %c0_i32_1 = arith.constant 0 : i32
    return %c0_i32, %c0_i32_0 : i32, i32
  }
  func.func @transform_2(%arg0: i32) -> (i32, i32) {
    %c0_i32 = arith.constant 0 : i32
    %c0_i32_0 = arith.constant 0 : i32
    %c0_i32_1 = arith.constant 0 : i32
    return %c0_i32, %c0_i32_0 : i32, i32
  }
  func.func @transform_3(%arg0: i32) -> (i32, i32) {
    %c0_i32 = arith.constant 0 : i32
    %c0_i32_0 = arith.constant 0 : i32
    %c0_i32_1 = arith.constant 0 : i32
    return %c0_i32, %c0_i32_0 : i32, i32
  }
  func.func @transform_4(%arg0: i32) -> (i32, i32) {
    %c0_i32 = arith.constant 0 : i32
    %c0_i32_0 = arith.constant 0 : i32
    %c0_i32_1 = arith.constant 0 : i32
    return %c0_i32, %c0_i32_0 : i32, i32
  }
  func.func @transform_5(%arg0: i32) -> (i32, i32) {
    %c0_i32 = arith.constant 0 : i32
    %c0_i32_0 = arith.constant 0 : i32
    %c0_i32_1 = arith.constant 0 : i32
    return %c0_i32, %c0_i32_0 : i32, i32
  }
  func.func @transform_6(%arg0: i32) -> (i32, i32) {
    %c0_i32 = arith.constant 0 : i32
    %c0_i32_0 = arith.constant 0 : i32
    %c0_i32_1 = arith.constant 0 : i32
    return %c0_i32, %c0_i32_0 : i32, i32
  }
  func.func @transform_7(%arg0: i32) -> (i32, i32) {
    %c0_i32 = arith.constant 0 : i32
    %c0_i32_0 = arith.constant 0 : i32
    return %arg0, %c0_i32 : i32, i32
  }
}

</mosaic_0001>

<bundles_post_ra>
// kernel: tpu_custom_call.1
= control target key start
LH: loop header
LB: loop body
LE: loop exit
PB: predicated region body
PF: predicated region fallthrough
CT: control target
= control target key end

     0   :  { %12 = vsyncpa [#allocation3], 0  ;;  %s595_s0 = inlined_call_operand.hbm [shape: f32[8,16], index: 0, kind: input, shape index: {}]   ;;  %s596_s1 = inlined_call_operand.hbm [shape: bf16[16,128], index: 1, kind: input, shape index: {}]   ;;  %s597_s2 = inlined_call_operand.vmem [shape: bf16[1,128], index: 2, kind: input, shape index: {}]   ;;  %s598_s3 = inlined_call_operand.hbm [shape: bf16[128,128], index: 3, kind: input, shape index: {}]   ;;  %s599_s4 = inlined_call_operand.vmem [shape: bf16[1,128], index: 4, kind: input, shape index: {}]   ;;  %s600_s5 = inlined_call_operand.hbm [shape: bf16[128,128], index: 5, kind: input, shape index: {}]   ;;  %s601_s6 = inlined_call_operand.vmem [shape: bf16[1,128], index: 6, kind: input, shape index: {}]   ;;  %s602_s7 = inlined_call_operand.hbm [shape: f32[8,128], index: 7, kind: output, shape index: {}]  }
   0x1   :  { %13 = vsyncpa [#allocation6], 0 }
   0x2   :  { %14 = vsyncpa [#allocation9], 0  ;;  %s31_s26 = sshll.u32 %s596_s1, 4  ;;  %s32_s26 = int_to_ptr.hbm [resolvable:$true] %s31_s26 }
   0x3   :  { %15 = vsyncpa [#allocation4], 0  ;;  %s524_s27 = smov [#allocation5]   ;;  %s21_s8 = sshll.u32 %s595_s0, 4  ;;  %s22_s8 = int_to_ptr.hbm [resolvable:$true] %s21_s8 }
   0x4   :  { %s33_s28 = sshll.u32 %s524_s27, 4  ;;  %s525_s9 = smov 64   ;;  %s34_s28 = int_to_ptr.vmem [resolvable:$true] %s33_s28 }
   0x5   :  { %s526_s10 = smov 4   ;;  %s527_s11 = smov [#allocation2]  }
   0x6   :  { %39 = dma.hbm_to_vmem [thread:$0]  %s32_s26, 128, %s34_s28, [#allocation6], %s525_s9, %s525_s9, %s526_s10  }
   0x7   :  { %s23_s12 = sshll.u32 %s527_s11, 4  ;;  %s46_s15 = sshll.u32 %s598_s3, 4  ;;  %s24_s12 = int_to_ptr.vmem [resolvable:$true] %s23_s12  ;;  %s47_s15 = int_to_ptr.hbm [resolvable:$true] %s46_s15 }
   0x8   :  { %26 = dma.hbm_to_vmem [thread:$0]  %s22_s8, 128, %s24_s12, [#allocation3]  }
   0x9   :  { %s61_s17 = sshll.u32 %s600_s5, 4  ;;  %s528_s18 = smov [#allocation7]   ;;  %s62_s17 = int_to_ptr.hbm [resolvable:$true] %s61_s17 }
   0xa   :  { %s48_s19 = sshll.u32 %s528_s18, 4  ;;  %s529_s0 = smov [#allocation8]   ;;  %s49_s19 = int_to_ptr.vmem [resolvable:$true] %s48_s19 }
   0xb   :  { %54 = dma.hbm_to_vmem [thread:$0]  %s47_s15, 1024, %s49_s19, [#allocation6], %s525_s9, %s525_s9, %s526_s10  }
   0xc   :  { %s63_s20 = sshll.u32 %s529_s0, 4  ;;  %s64_s20 = int_to_ptr.vmem [resolvable:$true] %s63_s20 }
   0xd   :  { %69 = dma.hbm_to_vmem [thread:$0]  %s62_s17, 1024, %s64_s20, [#allocation9], %s525_s9, %s525_s9, %s526_s10  }
   0xe   :  { %516 = dma.done.wait [#allocation3], 128  }
   0xf   :  { %517 = vsyncadd [#allocation3], 4294967168 }
  0x10   :  { %518 = dma.done.wait [#allocation6], 1152  }
  0x11   :  { %519 = vsyncadd [#allocation6], 4294966144 }
  0x12   :  { %520 = dma.done.wait [#allocation9], 1024  }
  0x13   :  { %521 = vsyncadd [#allocation9], 4294966272  ;;  %v372_v0 = vld [vmem:[#allocation5] sm:$0xff]  ;;  %v89_v1 = vld [vmem:[#allocation2] sm:$0xff]  ;;  %vm102_vm0 = vcmask 130048   ;;  %s530_s24 = smov [#allocation10]  }
  0x14   :  { %v380_v2 = vld [vmem:[#allocation7 + $0x38] sm:$0xff]  ;;  %v90_v3 = vpack.c.bf16 %v89_v1, %v89_v1  ;;  %113 = vmatpush.bf16.msra.mxu0 %v372_v0  ;;  %v379_v4 = vld [vmem:[#allocation7 + $0x30] sm:$0xff]  ;;  %v378_v5 = vld [vmem:[#allocation7 + $0x28] sm:$0xff]  ;;  %s289_s25 = sshll.u32 %s530_s24, 4  ;;  %s290_s25 = int_to_ptr.vmem [resolvable:$true] %s289_s25 }
  0x15   :  { %188 = vmatpush.bf16.msra.mxu1 %v380_v2  ;;  %v377_v6 = vld [vmem:[#allocation7 + $0x20] sm:$0xff]  ;;  %v376_v7 = vld [vmem:[#allocation7 + $0x18] sm:$0xff]  ;;  %v375_v8 = vld [vmem:[#allocation7 + $0x10] sm:$0xff] }
  0x16   :  { %v374_v9 = vld [vmem:[#allocation7 + $0x8] sm:$0xff]  ;;  %v373_v10 = vld [vmem:[#allocation7] sm:$0xff]  ;;  %v388_v11 = vld [vmem:[#allocation8 + $0x38] sm:$0xff] }
  0x17   :  { %307 = vmatmul.msk.bf16.vlgmr.msra.gmra.mxu0 %vm102_vm0, %v90_v3  ;;  %270 = vmatpush.bf16.msra.mxu2 %v388_v11  ;;  %v387_v12 = vld [vmem:[#allocation8 + $0x30] sm:$0xff]  ;;  %v386_v13 = vld [vmem:[#allocation8 + $0x28] sm:$0xff]  ;;  %v385_v14 = vld [vmem:[#allocation8 + $0x20] sm:$0xff] }
  0x18   :  { %v93_v15 = vld [vmem:[%s597_s2] sm:$0x1]  ;;  %v384_v16 = vld [vmem:[#allocation8 + $0x18] sm:$0xff]  ;;  %v382_v25 = vld [vmem:[#allocation8 + $0x8] sm:$0xff] }
  0x19   :  { %189 = vmatpush.bf16.msra.mxu1 %v379_v4  ;;  %v94_v17 = vunpack.c.l.bf16 %v93_v15  ;;  %v383_v18 = vld [vmem:[#allocation8 + $0x10] sm:$0xff]  ;;  %v381_v26 = vld [vmem:[#allocation8] sm:$0xff] }
  0x1a   :  { %v137_v27 = vld [vmem:[%s599_s4] sm:$0x1]  ;;  %s291_s4 = sshll.u32 %s602_s7, 4  ;;  %s292_s4 = int_to_ptr.hbm [resolvable:$true] %s291_s4 }
  0x1b   :  { %271 = vmatpush.bf16.msra.mxu2 %v387_v12  ;;  %v95_v19 = vperm.slane %v94_v17, 0  ;;  %v138_v28 = vunpack.c.l.bf16 %v137_v27  ;;  %v219_v35 = vld [vmem:[%s601_s6] sm:$0x1] }
  0x1c   :  { %v220_v36 = vunpack.c.l.bf16 %v219_v35 }
  0x1d   :  { %190 = vmatpush.bf16.msra.mxu1 %v378_v5  ;;  %v139_v29 = vperm.slane %v138_v28, 0 }
  0x1e   :  { %v221_v37 = vperm.slane %v220_v36, 0 }
  0x1f   :  { %272 = vmatpush.bf16.msra.mxu2 %v386_v13 }
  0x21   :  { %191 = vmatpush.bf16.msra.mxu1 %v377_v6 }
  0x23   :  { %273 = vmatpush.bf16.msra.mxu2 %v385_v14 }
  0x25   :  { %192 = vmatpush.bf16.msra.mxu1 %v376_v7 }
  0x27   :  { %274 = vmatpush.bf16.msra.mxu2 %v384_v16 }
  0x29   :  { %193 = vmatpush.bf16.msra.mxu1 %v375_v8 }
  0x2b   :  { %275 = vmatpush.bf16.msra.mxu2 %v383_v18 }
  0x2d   :  { %194 = vmatpush.bf16.msra.mxu1 %v374_v9 }
  0x2f   :  { %276 = vmatpush.bf16.msra.mxu2 %v382_v25 }
  0x31   :  { %195 = vmatpush.bf16.msra.mxu1 %v373_v10 }
  0x33   :  { %277 = vmatpush.bf16.msra.mxu2 %v381_v26 }
  0x94   :  { %v115_v20 = vpop.f32.mrf.mxu0 }
  0x95   :  { %v116_v21 = vadd.f32 %v115_v20, %v95_v19 }
  0x97   :  { %v119_v22 = vmax.f32 %v116_v21, 0.0 }
  0x99   :  { %v120_v23 = vpack.c.bf16 %v119_v22, %v119_v22 }
  0x9b   :  { %196 = vmatmul.bf16.vlgmr.msra.gmra.mxu1 %v120_v23 }
  0x9c   :  { %v117_v24 = vpop.f32.mrf.mxu0 }
 0x118   :  { %v197_v30 = vpop.f32.mrf.mxu1 }
 0x119   :  { %v198_v31 = vadd.f32 %v197_v30, %v139_v29 }
 0x11b   :  { %v201_v32 = vmax.f32 %v198_v31, 0.0 }
 0x11d   :  { %v202_v33 = vpack.c.bf16 %v201_v32, %v201_v32 }
 0x11f   :  { %278 = vmatmul.bf16.vlgmr.msra.gmra.mxu2 %v202_v33 }
 0x120   :  { %v199_v34 = vpop.f32.mrf.mxu1 }
 0x1a2   :  { %v279_v38 = vpop.f32.mrf.mxu2 }
 0x1a3   :  { %v280_v39 = vadd.f32 %v279_v38, %v221_v37 }
 0x1a5   :  { %283 = vst [vmem:[#allocation10] sm:$0xff] %v280_v39 }
 0x1a6   :  { %294 = dma.vmem_to_hbm [thread:$0]  %s290_s25, 128, %s292_s4, [#allocation4]  }
 0x1aa   :  { %v281_v40 = vpop.f32.mrf.mxu2 }
 0x1ab   :  { %522 = dma.done.wait [#allocation4], 128  }
 0x1ac   :  { %523 = vsyncadd [#allocation4], 4294967168 }
 0x1ad   :  { %299 = vsyncpa [#allocation3], 1 }
 0x1ae   :  { %300 = vsyncpa [#allocation6], 1 }
 0x1af   :  { %301 = vsyncpa [#allocation9], 1 }
 0x1b0   :  { %302 = vsyncpa [#allocation4], 1 }

// kernel: tpu_custom_call.1
= control target key start
LH: loop header
LB: loop body
LE: loop exit
PB: predicated region body
PF: predicated region fallthrough
CT: control target
= control target key end

     0   :  { %12 = vsyncpa [#allocation3], 0  ;;  %s595_s0 = inlined_call_operand.hbm [shape: f32[8,16], index: 0, kind: input, shape index: {}]   ;;  %s596_s1 = inlined_call_operand.hbm [shape: bf16[16,128], index: 1, kind: input, shape index: {}]   ;;  %s597_s2 = inlined_call_operand.vmem [shape: bf16[1,128], index: 2, kind: input, shape index: {}]   ;;  %s598_s3 = inlined_call_operand.hbm [shape: bf16[128,128], index: 3, kind: input, shape index: {}]   ;;  %s599_s4 = inlined_call_operand.vmem [shape: bf16[1,128], index: 4, kind: input, shape index: {}]   ;;  %s600_s5 = inlined_call_operand.hbm [shape: bf16[128,128], index: 5, kind: input, shape index: {}]   ;;  %s601_s6 = inlined_call_operand.vmem [shape: bf16[1,128], index: 6, kind: input, shape index: {}]   ;;  %s602_s7 = inlined_call_operand.hbm [shape: f32[8,128], index: 7, kind: output, shape index: {}]  }
   0x1   :  { %13 = vsyncpa [#allocation6], 0 }
   0x2   :  { %14 = vsyncpa [#allocation9], 0  ;;  %s31_s26 = sshll.u32 %s596_s1, 4  ;;  %s32_s26 = int_to_ptr.hbm [resolvable:$true] %s31_s26 }
   0x3   :  { %15 = vsyncpa [#allocation4], 0  ;;  %s524_s27 = smov [#allocation5]   ;;  %s21_s8 = sshll.u32 %s595_s0, 4  ;;  %s22_s8 = int_to_ptr.hbm [resolvable:$true] %s21_s8 }
   0x4   :  { %s33_s28 = sshll.u32 %s524_s27, 4  ;;  %s525_s9 = smov 64   ;;  %s34_s28 = int_to_ptr.vmem [resolvable:$true] %s33_s28 }
   0x5   :  { %s526_s10 = smov 4   ;;  %s527_s11 = smov [#allocation2]  }
   0x6   :  { %39 = dma.hbm_to_vmem [thread:$0]  %s32_s26, 128, %s34_s28, [#allocation6], %s525_s9, %s525_s9, %s526_s10  }
   0x7   :  { %s23_s12 = sshll.u32 %s527_s11, 4  ;;  %s46_s15 = sshll.u32 %s598_s3, 4  ;;  %s24_s12 = int_to_ptr.vmem [resolvable:$true] %s23_s12  ;;  %s47_s15 = int_to_ptr.hbm [resolvable:$true] %s46_s15 }
   0x8   :  { %26 = dma.hbm_to_vmem [thread:$0]  %s22_s8, 128, %s24_s12, [#allocation3]  }
   0x9   :  { %s61_s17 = sshll.u32 %s600_s5, 4  ;;  %s528_s18 = smov [#allocation7]   ;;  %s62_s17 = int_to_ptr.hbm [resolvable:$true] %s61_s17 }
   0xa   :  { %s48_s19 = sshll.u32 %s528_s18, 4  ;;  %s529_s0 = smov [#allocation8]   ;;  %s49_s19 = int_to_ptr.vmem [resolvable:$true] %s48_s19 }
   0xb   :  { %54 = dma.hbm_to_vmem [thread:$0]  %s47_s15, 1024, %s49_s19, [#allocation6], %s525_s9, %s525_s9, %s526_s10  }
   0xc   :  { %s63_s20 = sshll.u32 %s529_s0, 4  ;;  %s64_s20 = int_to_ptr.vmem [resolvable:$true] %s63_s20 }
   0xd   :  { %69 = dma.hbm_to_vmem [thread:$0]  %s62_s17, 1024, %s64_s20, [#allocation9], %s525_s9, %s525_s9, %s526_s10  }
   0xe   :  { %516 = dma.done.wait [#allocation3], 128  }
   0xf   :  { %517 = vsyncadd [#allocation3], 4294967168 }
  0x10   :  { %518 = dma.done.wait [#allocation6], 1152  }
  0x11   :  { %519 = vsyncadd [#allocation6], 4294966144 }
  0x12   :  { %520 = dma.done.wait [#allocation9], 1024  }
  0x13   :  { %521 = vsyncadd [#allocation9], 4294966272  ;;  %v372_v0 = vld [vmem:[#allocation5] sm:$0xff]  ;;  %v89_v1 = vld [vmem:[#allocation2] sm:$0xff]  ;;  %vm102_vm0 = vcmask 130048   ;;  %s530_s24 = smov [#allocation10]  }
  0x14   :  { %v380_v2 = vld [vmem:[#allocation7 + $0x38] sm:$0xff]  ;;  %v90_v3 = vpack.c.bf16 %v89_v1, %v89_v1  ;;  %113 = vmatpush.bf16.msra.mxu0 %v372_v0  ;;  %v379_v4 = vld [vmem:[#allocation7 + $0x30] sm:$0xff]  ;;  %v378_v5 = vld [vmem:[#allocation7 + $0x28] sm:$0xff]  ;;  %s289_s25 = sshll.u32 %s530_s24, 4  ;;  %s290_s25 = int_to_ptr.vmem [resolvable:$true] %s289_s25 }
  0x15   :  { %188 = vmatpush.bf16.msra.mxu1 %v380_v2  ;;  %v377_v6 = vld [vmem:[#allocation7 + $0x20] sm:$0xff]  ;;  %v376_v7 = vld [vmem:[#allocation7 + $0x18] sm:$0xff]  ;;  %v375_v8 = vld [vmem:[#allocation7 + $0x10] sm:$0xff] }
  0x16   :  { %v374_v9 = vld [vmem:[#allocation7 + $0x8] sm:$0xff]  ;;  %v373_v10 = vld [vmem:[#allocation7] sm:$0xff]  ;;  %v388_v11 = vld [vmem:[#allocation8 + $0x38] sm:$0xff] }
  0x17   :  { %307 = vmatmul.msk.bf16.vlgmr.msra.gmra.mxu0 %vm102_vm0, %v90_v3  ;;  %270 = vmatpush.bf16.msra.mxu2 %v388_v11  ;;  %v387_v12 = vld [vmem:[#allocation8 + $0x30] sm:$0xff]  ;;  %v386_v13 = vld [vmem:[#allocation8 + $0x28] sm:$0xff]  ;;  %v385_v14 = vld [vmem:[#allocation8 + $0x20] sm:$0xff] }
  0x18   :  { %v93_v15 = vld [vmem:[%s597_s2] sm:$0x1]  ;;  %v384_v16 = vld [vmem:[#allocation8 + $0x18] sm:$0xff]  ;;  %v382_v25 = vld [vmem:[#allocation8 + $0x8] sm:$0xff] }
  0x19   :  { %189 = vmatpush.bf16.msra.mxu1 %v379_v4  ;;  %v94_v17 = vunpack.c.l.bf16 %v93_v15  ;;  %v383_v18 = vld [vmem:[#allocation8 + $0x10] sm:$0xff]  ;;  %v381_v26 = vld [vmem:[#allocation8] sm:$0xff] }
  0x1a   :  { %v137_v27 = vld [vmem:[%s599_s4] sm:$0x1]  ;;  %s291_s4 = sshll.u32 %s602_s7, 4  ;;  %s292_s4 = int_to_ptr.hbm [resolvable:$true] %s291_s4 }
  0x1b   :  { %271 = vmatpush.bf16.msra.mxu2 %v387_v12  ;;  %v95_v19 = vperm.slane %v94_v17, 0  ;;  %v138_v28 = vunpack.c.l.bf16 %v137_v27  ;;  %v219_v35 = vld [vmem:[%s601_s6] sm:$0x1] }
  0x1c   :  { %v220_v36 = vunpack.c.l.bf16 %v219_v35 }
  0x1d   :  { %190 = vmatpush.bf16.msra.mxu1 %v378_v5  ;;  %v139_v29 = vperm.slane %v138_v28, 0 }
  0x1e   :  { %v221_v37 = vperm.slane %v220_v36, 0 }
  0x1f   :  { %272 = vmatpush.bf16.msra.mxu2 %v386_v13 }
  0x21   :  { %191 = vmatpush.bf16.msra.mxu1 %v377_v6 }
  0x23   :  { %273 = vmatpush.bf16.msra.mxu2 %v385_v14 }
  0x25   :  { %192 = vmatpush.bf16.msra.mxu1 %v376_v7 }
  0x27   :  { %274 = vmatpush.bf16.msra.mxu2 %v384_v16 }
  0x29   :  { %193 = vmatpush.bf16.msra.mxu1 %v375_v8 }
  0x2b   :  { %275 = vmatpush.bf16.msra.mxu2 %v383_v18 }
  0x2d   :  { %194 = vmatpush.bf16.msra.mxu1 %v374_v9 }
  0x2f   :  { %276 = vmatpush.bf16.msra.mxu2 %v382_v25 }
  0x31   :  { %195 = vmatpush.bf16.msra.mxu1 %v373_v10 }
  0x33   :  { %277 = vmatpush.bf16.msra.mxu2 %v381_v26 }
  0x94   :  { %v115_v20 = vpop.f32.mrf.mxu0 }
  0x95   :  { %v116_v21 = vadd.f32 %v115_v20, %v95_v19 }
  0x97   :  { %v119_v22 = vmax.f32 %v116_v21, 0.0 }
  0x99   :  { %v120_v23 = vpack.c.bf16 %v119_v22, %v119_v22 }
  0x9b   :  { %196 = vmatmul.bf16.vlgmr.msra.gmra.mxu1 %v120_v23 }
  0x9c   :  { %v117_v24 = vpop.f32.mrf.mxu0 }
 0x118   :  { %v197_v30 = vpop.f32.mrf.mxu1 }
 0x119   :  { %v198_v31 = vadd.f32 %v197_v30, %v139_v29 }
 0x11b   :  { %v201_v32 = vmax.f32 %v198_v31, 0.0 }
 0x11d   :  { %v202_v33 = vpack.c.bf16 %v201_v32, %v201_v32 }
 0x11f   :  { %278 = vmatmul.bf16.vlgmr.msra.gmra.mxu2 %v202_v33 }
 0x120   :  { %v199_v34 = vpop.f32.mrf.mxu1 }
 0x1a2   :  { %v279_v38 = vpop.f32.mrf.mxu2 }
 0x1a3   :  { %v280_v39 = vadd.f32 %v279_v38, %v221_v37 }
 0x1a5   :  { %283 = vst [vmem:[#allocation10] sm:$0xff] %v280_v39 }
 0x1a6   :  { %294 = dma.vmem_to_hbm [thread:$0]  %s290_s25, 128, %s292_s4, [#allocation4]  }
 0x1aa   :  { %v281_v40 = vpop.f32.mrf.mxu2 }
 0x1ab   :  { %522 = dma.done.wait [#allocation4], 128  }
 0x1ac   :  { %523 = vsyncadd [#allocation4], 4294967168 }
 0x1ad   :  { %299 = vsyncpa [#allocation3], 1 }
 0x1ae   :  { %300 = vsyncpa [#allocation6], 1 }
 0x1af   :  { %301 = vsyncpa [#allocation9], 1 }
 0x1b0   :  { %302 = vsyncpa [#allocation4], 1 }

</bundles_post_ra>
